<compile_context>
chip_gen: v5e
topology: v5e:2x2
jax: 0.10.0
libtpu: 0.0.40
codegen_flags: <defaults>
</compile_context>

<pallas_src>
import functools

import jax
import jax.numpy as jnp
from jax.experimental import pallas as pl
from jax.experimental.pallas import tpu as pltpu


def _cdiv(a, b):
    return -(-a // b)


def _round_up(a, m):
    return _cdiv(a, m) * m


def _choose_tile(n, max_tile):
    """Lane tile: big enough to amortize per-step pipeline overhead, small enough
    that the grid has >= 2 blocks (keeps both v7x TensorCores busy)."""
    n128 = _round_up(max(n, 1), 128)
    if n128 <= 128:
        return 128
    blocks = max(2, _cdiv(n128, max_tile))
    return min(max_tile, _round_up(_cdiv(n128, blocks), 128))


def _matvec_vpu(w, x):
    """(J, K) @ (K, tile) -> (J, tile) as K unrolled broadcast-FMAs on the VPU.

    K = 10 here: far too small for the MXU.  The per-k row/column broadcasts land on
    the XLU slot, which has slack while the kernel is overhead/HBM/VALU bound.
    """
    K = w.shape[1]
    acc = w[:, 0:1] * x[0:1, :]
    for k in range(1, K):
        acc = acc + w[:, k:k + 1] * x[k:k + 1, :]
    return acc


def _epinet_kernel(t_ref, ph_ref, po_ref, o_ref, *, compute_dtype):
    # t_ref : (1, tile)      batch on the 128-lane axis
    # ph_ref: (H, H + 3)     packed [w1 | b1 | w2 | b2]  (resident, constant index_map)
    # po_ref: (O, H + 1)     packed [w3 | b3]
    # o_ref : (O, tile)      lane-dense (transposed) output
    H = ph_ref.shape[0]

    t = t_ref[...].astype(compute_dtype)                       # (1, tile)
    ph = ph_ref[...].astype(compute_dtype)
    po = po_ref[...].astype(compute_dtype)
    w1, b1 = ph[:, 0:1], ph[:, 1:2]                             # (H, 1), (H, 1)
    w2, b2 = ph[:, 2:2 + H], ph[:, 2 + H:3 + H]                 # (H, H), (H, 1)
    w3, b3 = po[:, 0:H], po[:, H:H + 1]                         # (O, H), (O, 1)

    # Layer 1: K = 1 contraction -> pure VPU outer-product broadcast.
    h = jnp.tanh(w1 * t + b1)                                   # (H, tile)
    # Dropout(p) -> identity (eval mode).

    # Layer 2: tiny K = H contraction, unrolled on the VPU.
    h = jnp.tanh(_matvec_vpu(w2, h) + b2)                       # (H, tile)
    # Dropout(p) -> identity (eval mode).

    # Layer 3: lane-dense (O, tile) result.
    out = _matvec_vpu(w3, h) + b3                               # (O, tile)
    o_ref[...] = out.astype(o_ref.dtype)


@functools.partial(
    jax.jit, static_argnames=("tile", "max_tile", "compute_dtype", "lane_major"))
def epinet_forward(t, w1, b1, w2, b2, w3, b3, *, tile=None, max_tile=8192,
                   compute_dtype=jnp.float32, lane_major=False):
    """EpiNet forward.

    t: (N, 1) float32; weights in PyTorch (out_features, in_features) layout.
    Returns (N, O) float32 (PyTorch convention).  lane_major=True returns the
    kernel's lane-dense (O, N) output directly, skipping the transpose pass.
    compute_dtype=jnp.bfloat16 halves VPU/EUP work (recommended on v6e/v7x;
    keep f32 on v5e and for strict-tolerance validation).
    """
    N = t.shape[0]
    H = w1.shape[0]
    O = w3.shape[0]

    if tile is None:
        tile = _choose_tile(N, max_tile)
    assert tile % 128 == 0, "tile must keep the batch lane-dense (multiple of 128)"

    n_blocks = _cdiv(N, tile)
    n_pad = n_blocks * tile

    # Batch on the lane axis: (1, N_pad) row.  Aligned case = free reshape;
    # ragged case pads only the tail block.
    t_row = t.reshape(1, N).astype(jnp.float32)
    if n_pad != N:
        t_row = jnp.pad(t_row, ((0, 0), (0, n_pad - N)))

    # Pack parameters into two tiny blocks with constant index_maps:
    # 2 resident VMEM blocks / DMAs instead of 6.
    ph = jnp.concatenate(
        [w1.reshape(H, 1), b1.reshape(H, 1), w2.reshape(H, H), b2.reshape(H, 1)],
        axis=1).astype(jnp.float32)                              # (H, H + 3)
    po = jnp.concatenate(
        [w3.reshape(O, H), b3.reshape(O, 1)], axis=1).astype(jnp.float32)  # (O, H + 1)

    kernel = functools.partial(_epinet_kernel, compute_dtype=compute_dtype)
    const = lambda shape: pl.BlockSpec(shape, lambda i: (0, 0))

    out_t = pl.pallas_call(
        kernel,
        out_shape=jax.ShapeDtypeStruct((O, n_pad), jnp.float32),
        grid_spec=pltpu.PrefetchScalarGridSpec(
            num_scalar_prefetch=0,
            grid=(n_blocks,),
            in_specs=[
                pl.BlockSpec((1, tile), lambda i: (0, i)),   # t tile (batch on lanes)
                const((H, H + 3)),                           # packed [w1|b1|w2|b2]
                const((O, H + 1)),                           # packed [w3|b3]
            ],
            out_specs=pl.BlockSpec((O, tile), lambda i: (0, i)),
        ),
        compiler_params=pltpu.CompilerParams(
            # Independent batch tiles -> shards across v7x's two TensorCores,
            # neutral on single-TC v5e/v6e.
            dimension_semantics=("parallel",),
            # Only needed for very large user-chosen tiles (v5e default scoped
            # VMEM limit is 16 MiB); the default tile never triggers this.
            vmem_limit_bytes=(64 * 1024 * 1024) if tile > 8192 else None,
        ),
    )(t_row, ph, po)

    if n_pad != N:
        out_t = out_t[:, :N]   # drop garbage computed on the padded tail lanes
    if lane_major:
        return out_t           # (O, N), lane-dense; no extra HBM pass
    # PyTorch convention (N, O).  NOTE: this XLA transpose re-reads/re-writes the
    # whole result; prefer lane_major=True with a layout-aware consumer.
    return out_t.T


def init_epinet_params(key, hidden_neurons=10, output_size=6):
    """Xavier-normal init with tanh gain (5/3), zero biases (matches init_xavier)."""
    gain = 5.0 / 3.0  # nn.init.calculate_gain('tanh')

    def xavier_normal(k, out_f, in_f):
        std = gain * jnp.sqrt(2.0 / (in_f + out_f))
        return std * jax.random.normal(k, (out_f, in_f), dtype=jnp.float32)

    k1, k2, k3 = jax.random.split(key, 3)
    w1 = xavier_normal(k1, hidden_neurons, 1)
    b1 = jnp.zeros((hidden_neurons,), jnp.float32)
    w2 = xavier_normal(k2, hidden_neurons, hidden_neurons)
    b2 = jnp.zeros((hidden_neurons,), jnp.float32)
    w3 = xavier_normal(k3, output_size, hidden_neurons)
    b3 = jnp.zeros((output_size,), jnp.float32)
    return w1, b1, w2, b2, w3, b3


def epinet_reference(t, w1, b1, w2, b2, w3, b3):
    h = jnp.tanh(t @ w1.T + b1)
    h = jnp.tanh(h @ w2.T + b2)
    return h @ w3.T + b3


if __name__ == "__main__":
    key = jax.random.PRNGKey(0)
    pkey, tkey = jax.random.split(key)

    hidden_neurons = 10
    output_size = 6
    N = 200  # deliberately ragged: pads only the tail block; auto-tile -> 2 grid blocks

    params = init_epinet_params(pkey, hidden_neurons, output_size)
    t = jax.random.uniform(tkey, (N, 1), dtype=jnp.float32)

    ref = epinet_reference(t, *params)

    # Default f32 path: strict check against the pure-JAX reference.
    out = jax.block_until_ready(epinet_forward(t, *params))
    assert out.shape == (N, output_size)
    assert jnp.allclose(out, ref, atol=1e-5, rtol=1e-5), "f32 mismatch vs reference"

    # Lane-major output (skips the wrapper transpose for fused consumers).
    out_lm = jax.block_until_ready(epinet_forward(t, *params, lane_major=True))
    assert out_lm.shape == (output_size, N)
    assert jnp.allclose(out_lm.T, ref, atol=1e-5, rtol=1e-5), "lane-major mismatch"

    # bf16 activation path (recommended on v6e/v7x); loose tolerance by design.
    out_bf16 = jax.block_until_ready(
        epinet_forward(t, *params, compute_dtype=jnp.bfloat16))
    assert out_bf16.shape == (N, output_size)
    assert jnp.max(jnp.abs(out_bf16 - ref)) < 2e-1, "bf16 path diverged"

    print("KERNEL_OK")
</pallas_src>

<mosaic_0001>
module attributes {stable_mosaic.version = 11 : i64} {
  func.func @_epinet_kernel(%arg0: i32, %arg1: memref<1x128xf32, #tpu.memory_space<vmem>>, %arg2: memref<10x13xf32, #tpu.memory_space<vmem>>, %arg3: memref<6x11xf32, #tpu.memory_space<vmem>>, %arg4: memref<6x128xf32, #tpu.memory_space<vmem>>) attributes {dimension_semantics = [#tpu.dimension_semantics<parallel>], iteration_bounds = array<i64: 2>, scalar_prefetch = 0 : i64, scratch_operands = 0 : i64, tpu.core_type = #tpu.core_type<tc>, window_params = [{transform_indices = @transform_0, window_bounds = array<i64: 1, 128>}, {pipeline_mode = #tpu.pipeline_mode<synchronous>, transform_indices = @transform_1, window_bounds = array<i64: 10, 13>}, {pipeline_mode = #tpu.pipeline_mode<synchronous>, transform_indices = @transform_2, window_bounds = array<i64: 6, 11>}, {transform_indices = @transform_3, window_bounds = array<i64: 6, 128>}]} {
    %c0 = arith.constant 0 : index
    %c0_0 = arith.constant 0 : index
    %0 = vector.load %arg1[%c0, %c0_0] : memref<1x128xf32, #tpu.memory_space<vmem>>, vector<1x128xf32>
    %c0_1 = arith.constant 0 : index
    %c0_2 = arith.constant 0 : index
    %1 = vector.load %arg2[%c0_1, %c0_2] : memref<10x13xf32, #tpu.memory_space<vmem>>, vector<10x13xf32>
    %c0_3 = arith.constant 0 : index
    %c0_4 = arith.constant 0 : index
    %2 = vector.load %arg3[%c0_3, %c0_4] : memref<6x11xf32, #tpu.memory_space<vmem>>, vector<6x11xf32>
    %3 = vector.extract_strided_slice %1 {offsets = [0, 0], sizes = [10, 1], strides = [1, 1]} : vector<10x13xf32> to vector<10x1xf32>
    %4 = vector.extract_strided_slice %1 {offsets = [0, 1], sizes = [10, 1], strides = [1, 1]} : vector<10x13xf32> to vector<10x1xf32>
    %5 = vector.extract_strided_slice %1 {offsets = [0, 2], sizes = [10, 10], strides = [1, 1]} : vector<10x13xf32> to vector<10x10xf32>
    %6 = vector.extract_strided_slice %1 {offsets = [0, 12], sizes = [10, 1], strides = [1, 1]} : vector<10x13xf32> to vector<10x1xf32>
    %7 = vector.extract_strided_slice %2 {offsets = [0, 0], sizes = [6, 10], strides = [1, 1]} : vector<6x11xf32> to vector<6x10xf32>
    %8 = vector.extract_strided_slice %2 {offsets = [0, 10], sizes = [6, 1], strides = [1, 1]} : vector<6x11xf32> to vector<6x1xf32>
    %9 = vector.broadcast %3 : vector<10x1xf32> to vector<10x128xf32>
    %10 = vector.broadcast %0 : vector<1x128xf32> to vector<10x128xf32>
    %11 = arith.mulf %9, %10 : vector<10x128xf32>
    %12 = vector.broadcast %4 : vector<10x1xf32> to vector<10x128xf32>
    %13 = arith.addf %11, %12 : vector<10x128xf32>
    %14 = math.tanh %13 : vector<10x128xf32>
    %15 = vector.extract_strided_slice %5 {offsets = [0, 0], sizes = [10, 1], strides = [1, 1]} : vector<10x10xf32> to vector<10x1xf32>
    %16 = vector.extract_strided_slice %14 {offsets = [0, 0], sizes = [1, 128], strides = [1, 1]} : vector<10x128xf32> to vector<1x128xf32>
    %17 = vector.broadcast %15 : vector<10x1xf32> to vector<10x128xf32>
    %18 = vector.broadcast %16 : vector<1x128xf32> to vector<10x128xf32>
    %19 = arith.mulf %17, %18 : vector<10x128xf32>
    %20 = vector.extract_strided_slice %5 {offsets = [0, 1], sizes = [10, 1], strides = [1, 1]} : vector<10x10xf32> to vector<10x1xf32>
    %21 = vector.extract_strided_slice %14 {offsets = [1, 0], sizes = [1, 128], strides = [1, 1]} : vector<10x128xf32> to vector<1x128xf32>
    %22 = vector.broadcast %20 : vector<10x1xf32> to vector<10x128xf32>
    %23 = vector.broadcast %21 : vector<1x128xf32> to vector<10x128xf32>
    %24 = arith.mulf %22, %23 : vector<10x128xf32>
    %25 = arith.addf %19, %24 : vector<10x128xf32>
    %26 = vector.extract_strided_slice %5 {offsets = [0, 2], sizes = [10, 1], strides = [1, 1]} : vector<10x10xf32> to vector<10x1xf32>
    %27 = vector.extract_strided_slice %14 {offsets = [2, 0], sizes = [1, 128], strides = [1, 1]} : vector<10x128xf32> to vector<1x128xf32>
    %28 = vector.broadcast %26 : vector<10x1xf32> to vector<10x128xf32>
    %29 = vector.broadcast %27 : vector<1x128xf32> to vector<10x128xf32>
    %30 = arith.mulf %28, %29 : vector<10x128xf32>
    %31 = arith.addf %25, %30 : vector<10x128xf32>
    %32 = vector.extract_strided_slice %5 {offsets = [0, 3], sizes = [10, 1], strides = [1, 1]} : vector<10x10xf32> to vector<10x1xf32>
    %33 = vector.extract_strided_slice %14 {offsets = [3, 0], sizes = [1, 128], strides = [1, 1]} : vector<10x128xf32> to vector<1x128xf32>
    %34 = vector.broadcast %32 : vector<10x1xf32> to vector<10x128xf32>
    %35 = vector.broadcast %33 : vector<1x128xf32> to vector<10x128xf32>
    %36 = arith.mulf %34, %35 : vector<10x128xf32>
    %37 = arith.addf %31, %36 : vector<10x128xf32>
    %38 = vector.extract_strided_slice %5 {offsets = [0, 4], sizes = [10, 1], strides = [1, 1]} : vector<10x10xf32> to vector<10x1xf32>
    %39 = vector.extract_strided_slice %14 {offsets = [4, 0], sizes = [1, 128], strides = [1, 1]} : vector<10x128xf32> to vector<1x128xf32>
    %40 = vector.broadcast %38 : vector<10x1xf32> to vector<10x128xf32>
    %41 = vector.broadcast %39 : vector<1x128xf32> to vector<10x128xf32>
    %42 = arith.mulf %40, %41 : vector<10x128xf32>
    %43 = arith.addf %37, %42 : vector<10x128xf32>
    %44 = vector.extract_strided_slice %5 {offsets = [0, 5], sizes = [10, 1], strides = [1, 1]} : vector<10x10xf32> to vector<10x1xf32>
    %45 = vector.extract_strided_slice %14 {offsets = [5, 0], sizes = [1, 128], strides = [1, 1]} : vector<10x128xf32> to vector<1x128xf32>
    %46 = vector.broadcast %44 : vector<10x1xf32> to vector<10x128xf32>
    %47 = vector.broadcast %45 : vector<1x128xf32> to vector<10x128xf32>
    %48 = arith.mulf %46, %47 : vector<10x128xf32>
    %49 = arith.addf %43, %48 : vector<10x128xf32>
    %50 = vector.extract_strided_slice %5 {offsets = [0, 6], sizes = [10, 1], strides = [1, 1]} : vector<10x10xf32> to vector<10x1xf32>
    %51 = vector.extract_strided_slice %14 {offsets = [6, 0], sizes = [1, 128], strides = [1, 1]} : vector<10x128xf32> to vector<1x128xf32>
    %52 = vector.broadcast %50 : vector<10x1xf32> to vector<10x128xf32>
    %53 = vector.broadcast %51 : vector<1x128xf32> to vector<10x128xf32>
    %54 = arith.mulf %52, %53 : vector<10x128xf32>
    %55 = arith.addf %49, %54 : vector<10x128xf32>
    %56 = vector.extract_strided_slice %5 {offsets = [0, 7], sizes = [10, 1], strides = [1, 1]} : vector<10x10xf32> to vector<10x1xf32>
    %57 = vector.extract_strided_slice %14 {offsets = [7, 0], sizes = [1, 128], strides = [1, 1]} : vector<10x128xf32> to vector<1x128xf32>
    %58 = vector.broadcast %56 : vector<10x1xf32> to vector<10x128xf32>
    %59 = vector.broadcast %57 : vector<1x128xf32> to vector<10x128xf32>
    %60 = arith.mulf %58, %59 : vector<10x128xf32>
    %61 = arith.addf %55, %60 : vector<10x128xf32>
    %62 = vector.extract_strided_slice %5 {offsets = [0, 8], sizes = [10, 1], strides = [1, 1]} : vector<10x10xf32> to vector<10x1xf32>
    %63 = vector.extract_strided_slice %14 {offsets = [8, 0], sizes = [1, 128], strides = [1, 1]} : vector<10x128xf32> to vector<1x128xf32>
    %64 = vector.broadcast %62 : vector<10x1xf32> to vector<10x128xf32>
    %65 = vector.broadcast %63 : vector<1x128xf32> to vector<10x128xf32>
    %66 = arith.mulf %64, %65 : vector<10x128xf32>
    %67 = arith.addf %61, %66 : vector<10x128xf32>
    %68 = vector.extract_strided_slice %5 {offsets = [0, 9], sizes = [10, 1], strides = [1, 1]} : vector<10x10xf32> to vector<10x1xf32>
    %69 = vector.extract_strided_slice %14 {offsets = [9, 0], sizes = [1, 128], strides = [1, 1]} : vector<10x128xf32> to vector<1x128xf32>
    %70 = vector.broadcast %68 : vector<10x1xf32> to vector<10x128xf32>
    %71 = vector.broadcast %69 : vector<1x128xf32> to vector<10x128xf32>
    %72 = arith.mulf %70, %71 : vector<10x128xf32>
    %73 = arith.addf %67, %72 : vector<10x128xf32>
    %74 = vector.broadcast %6 : vector<10x1xf32> to vector<10x128xf32>
    %75 = arith.addf %73, %74 : vector<10x128xf32>
    %76 = math.tanh %75 : vector<10x128xf32>
    %77 = vector.extract_strided_slice %7 {offsets = [0, 0], sizes = [6, 1], strides = [1, 1]} : vector<6x10xf32> to vector<6x1xf32>
    %78 = vector.extract_strided_slice %76 {offsets = [0, 0], sizes = [1, 128], strides = [1, 1]} : vector<10x128xf32> to vector<1x128xf32>
    %79 = vector.broadcast %77 : vector<6x1xf32> to vector<6x128xf32>
    %80 = vector.broadcast %78 : vector<1x128xf32> to vector<6x128xf32>
    %81 = arith.mulf %79, %80 : vector<6x128xf32>
    %82 = vector.extract_strided_slice %7 {offsets = [0, 1], sizes = [6, 1], strides = [1, 1]} : vector<6x10xf32> to vector<6x1xf32>
    %83 = vector.extract_strided_slice %76 {offsets = [1, 0], sizes = [1, 128], strides = [1, 1]} : vector<10x128xf32> to vector<1x128xf32>
    %84 = vector.broadcast %82 : vector<6x1xf32> to vector<6x128xf32>
    %85 = vector.broadcast %83 : vector<1x128xf32> to vector<6x128xf32>
    %86 = arith.mulf %84, %85 : vector<6x128xf32>
    %87 = arith.addf %81, %86 : vector<6x128xf32>
    %88 = vector.extract_strided_slice %7 {offsets = [0, 2], sizes = [6, 1], strides = [1, 1]} : vector<6x10xf32> to vector<6x1xf32>
    %89 = vector.extract_strided_slice %76 {offsets = [2, 0], sizes = [1, 128], strides = [1, 1]} : vector<10x128xf32> to vector<1x128xf32>
    %90 = vector.broadcast %88 : vector<6x1xf32> to vector<6x128xf32>
    %91 = vector.broadcast %89 : vector<1x128xf32> to vector<6x128xf32>
    %92 = arith.mulf %90, %91 : vector<6x128xf32>
    %93 = arith.addf %87, %92 : vector<6x128xf32>
    %94 = vector.extract_strided_slice %7 {offsets = [0, 3], sizes = [6, 1], strides = [1, 1]} : vector<6x10xf32> to vector<6x1xf32>
    %95 = vector.extract_strided_slice %76 {offsets = [3, 0], sizes = [1, 128], strides = [1, 1]} : vector<10x128xf32> to vector<1x128xf32>
    %96 = vector.broadcast %94 : vector<6x1xf32> to vector<6x128xf32>
    %97 = vector.broadcast %95 : vector<1x128xf32> to vector<6x128xf32>
    %98 = arith.mulf %96, %97 : vector<6x128xf32>
    %99 = arith.addf %93, %98 : vector<6x128xf32>
    %100 = vector.extract_strided_slice %7 {offsets = [0, 4], sizes = [6, 1], strides = [1, 1]} : vector<6x10xf32> to vector<6x1xf32>
    %101 = vector.extract_strided_slice %76 {offsets = [4, 0], sizes = [1, 128], strides = [1, 1]} : vector<10x128xf32> to vector<1x128xf32>
    %102 = vector.broadcast %100 : vector<6x1xf32> to vector<6x128xf32>
    %103 = vector.broadcast %101 : vector<1x128xf32> to vector<6x128xf32>
    %104 = arith.mulf %102, %103 : vector<6x128xf32>
    %105 = arith.addf %99, %104 : vector<6x128xf32>
    %106 = vector.extract_strided_slice %7 {offsets = [0, 5], sizes = [6, 1], strides = [1, 1]} : vector<6x10xf32> to vector<6x1xf32>
    %107 = vector.extract_strided_slice %76 {offsets = [5, 0], sizes = [1, 128], strides = [1, 1]} : vector<10x128xf32> to vector<1x128xf32>
    %108 = vector.broadcast %106 : vector<6x1xf32> to vector<6x128xf32>
    %109 = vector.broadcast %107 : vector<1x128xf32> to vector<6x128xf32>
    %110 = arith.mulf %108, %109 : vector<6x128xf32>
    %111 = arith.addf %105, %110 : vector<6x128xf32>
    %112 = vector.extract_strided_slice %7 {offsets = [0, 6], sizes = [6, 1], strides = [1, 1]} : vector<6x10xf32> to vector<6x1xf32>
    %113 = vector.extract_strided_slice %76 {offsets = [6, 0], sizes = [1, 128], strides = [1, 1]} : vector<10x128xf32> to vector<1x128xf32>
    %114 = vector.broadcast %112 : vector<6x1xf32> to vector<6x128xf32>
    %115 = vector.broadcast %113 : vector<1x128xf32> to vector<6x128xf32>
    %116 = arith.mulf %114, %115 : vector<6x128xf32>
    %117 = arith.addf %111, %116 : vector<6x128xf32>
    %118 = vector.extract_strided_slice %7 {offsets = [0, 7], sizes = [6, 1], strides = [1, 1]} : vector<6x10xf32> to vector<6x1xf32>
    %119 = vector.extract_strided_slice %76 {offsets = [7, 0], sizes = [1, 128], strides = [1, 1]} : vector<10x128xf32> to vector<1x128xf32>
    %120 = vector.broadcast %118 : vector<6x1xf32> to vector<6x128xf32>
    %121 = vector.broadcast %119 : vector<1x128xf32> to vector<6x128xf32>
    %122 = arith.mulf %120, %121 : vector<6x128xf32>
    %123 = arith.addf %117, %122 : vector<6x128xf32>
    %124 = vector.extract_strided_slice %7 {offsets = [0, 8], sizes = [6, 1], strides = [1, 1]} : vector<6x10xf32> to vector<6x1xf32>
    %125 = vector.extract_strided_slice %76 {offsets = [8, 0], sizes = [1, 128], strides = [1, 1]} : vector<10x128xf32> to vector<1x128xf32>
    %126 = vector.broadcast %124 : vector<6x1xf32> to vector<6x128xf32>
    %127 = vector.broadcast %125 : vector<1x128xf32> to vector<6x128xf32>
    %128 = arith.mulf %126, %127 : vector<6x128xf32>
    %129 = arith.addf %123, %128 : vector<6x128xf32>
    %130 = vector.extract_strided_slice %7 {offsets = [0, 9], sizes = [6, 1], strides = [1, 1]} : vector<6x10xf32> to vector<6x1xf32>
    %131 = vector.extract_strided_slice %76 {offsets = [9, 0], sizes = [1, 128], strides = [1, 1]} : vector<10x128xf32> to vector<1x128xf32>
    %132 = vector.broadcast %130 : vector<6x1xf32> to vector<6x128xf32>
    %133 = vector.broadcast %131 : vector<1x128xf32> to vector<6x128xf32>
    %134 = arith.mulf %132, %133 : vector<6x128xf32>
    %135 = arith.addf %129, %134 : vector<6x128xf32>
    %136 = vector.broadcast %8 : vector<6x1xf32> to vector<6x128xf32>
    %137 = arith.addf %135, %136 : vector<6x128xf32>
    %c0_5 = arith.constant 0 : index
    %c0_6 = arith.constant 0 : index
    %138 = vector.load %arg4[%c0_5, %c0_6] : memref<6x128xf32, #tpu.memory_space<vmem>>, vector<6x128xf32>
    tpu.vector_store %arg4[%c0_5, %c0_6], %137 {strides = array<i32>} : memref<6x128xf32, #tpu.memory_space<vmem>>, vector<6x128xf32>,
    return
  }
  func.func @transform_0(%arg0: i32) -> (i32, i32) {
    %c0_i32 = arith.constant 0 : i32
    %c0_i32_0 = arith.constant 0 : i32
    return %c0_i32, %arg0 : i32, i32
  }
  func.func @transform_1(%arg0: i32) -> (i32, i32) {
    %c0_i32 = arith.constant 0 : i32
    %c0_i32_0 = arith.constant 0 : i32
    %c0_i32_1 = arith.constant 0 : i32
    return %c0_i32, %c0_i32_0 : i32, i32
  }
  func.func @transform_2(%arg0: i32) -> (i32, i32) {
    %c0_i32 = arith.constant 0 : i32
    %c0_i32_0 = arith.constant 0 : i32
    %c0_i32_1 = arith.constant 0 : i32
    return %c0_i32, %c0_i32_0 : i32, i32
  }
  func.func @transform_3(%arg0: i32) -> (i32, i32) {
    %c0_i32 = arith.constant 0 : i32
    %c0_i32_0 = arith.constant 0 : i32
    return %c0_i32, %arg0 : i32, i32
  }
}

</mosaic_0001>

<bundles_post_ra>
// kernel: epinet_forward.1
= control target key start
LH: loop header
LB: loop body
LE: loop exit
PB: predicated region body
PF: predicated region fallthrough
CT: control target
= control target key end

     0   :  { %s573_s12 = smov 0   ;;  %s627_s0 = inlined_call_operand.vmem [shape: f32[1,256], index: 0, kind: input, shape index: {}]   ;;  %s628_s1 = inlined_call_operand.vmem [shape: f32[10,13], index: 1, kind: input, shape index: {}]   ;;  %s629_s2 = inlined_call_operand.vmem [shape: f32[6,11], index: 2, kind: input, shape index: {}]   ;;  %s630_s3 = inlined_call_operand.vmem [shape: f32[6,256], index: 3, kind: output, shape index: {}]  }
   0x1 LB: > { %s460_s13 = sadd.s32 4294967295, %s538_s12   ;;  %p464_p0 = scmp.ge.s32.totalorder %s538_s12, 1  ;;  %s538_s12 = sphi %s573_s12, %s13_s12  }
   0x2   : > { %p135_p1 = scmp.lt.s32.totalorder %s538_s12, 3 }
   0x4   : > { %p136_p2 = pnand %p464_p0, %p135_p1 }
   0x5   : > { %p156_p3 = scmp.lt.s32.totalorder (!%p136_p2), %s460_s13, 1 }
   0x6   : > { %139 = sbr.rel (%p136_p2) target bundleno = 256 (0x100), region = 32 }
   0xb   : > { %v584_v0 = vld [vmem:[%s628_s1] sm:$0xff]  ;;  %v540_v1 = vmov 2   ;;  %v541_v2 = vmov 1   ;;  %v542_v3 = vmov 0   ;;  %s632_s13 = smov (!%p156_p3, %s460_s13), 1  ;;  %v543_v5 = vmov 4  }
   0xc   : > { %491 = vset.pattern.permute.xlu2 %v540_v1  ;;  %490 = vset.pattern.permute.xlu1 %v541_v2  ;;  %s158_s18 = scalar_lea.vmem %s627_s0, %s632_s13  ;;  %v165_v4 = vld [vmem:[%s628_s1 + $0x8] sm:$0x3]  ;;  %v544_v6 = vmov 3   ;;  %v545_v7 = vmov 5   ;;  %v546_v8 = vmov 6   ;;  %v547_v9 = vmov 8  }
   0xd   : > { %489 = vset.pattern.permute.xlu0 %v542_v3  ;;  %195 = vperm.xlu2 %491, %v584_v0   ;;  %v548_v10 = vmov 7   ;;  %v549_v11 = vmov 10   ;;  %v550_v12 = vmov 9   ;;  %v166_v13 = vld [vmem:[%s629_s2] sm:$0x3f]  ;;  %v551_v14 = vmov 11  }
   0xe   : > { %183 = vperm.xlu1 %490, %v584_v0   ;;  %169 = vperm.xlu0 %489, %v584_v0   ;;  %v552_v15 = vmov 12   ;;  %v523_v25 = vld [vmem:[%s158_s18] ss:$0 sm:$0xff]  ;;  %s465_s25 = sshll.u32 %s632_s13, 3 }
   0xf   : > { %s162_s28 = scalar_lea.vmem %s630_s3, %s465_s25 }
  0x15   : > { %199 = vperm.xlu2 %491, %v165_v4  }
  0x16   : > { %187 = vperm.xlu1 %490, %v165_v4   ;;  %174 = vperm.xlu0 %489, %v165_v4  }
  0x1d   : > { %494 = vset.pattern.permute.xlu2 %v543_v5 }
  0x1e   : > { %493 = vset.pattern.permute.xlu1 %v544_v6  ;;  %492 = vset.pattern.permute.xlu0 %v544_v6 }
  0x1f   : > { %219 = vperm.xlu2 %494, %v584_v0   ;;  %210 = vperm.xlu1 %493, %v165_v4  }
  0x20   : > { %206 = vperm.xlu0 %492, %v584_v0  }
  0x27   : > { %496 = vset.pattern.permute.xlu2 %v545_v7  ;;  %495 = vset.pattern.permute.xlu1 %v543_v5 }
  0x28   : > { %497 = vset.pattern.permute.xlu0 %v545_v7  ;;  %232 = vperm.xlu2 %496, %v584_v0  }
  0x29   : > { %223 = vperm.xlu1 %495, %v165_v4   ;;  %236 = vperm.xlu0 %497, %v165_v4  }
  0x30   : > { %499 = vset.pattern.permute.xlu2 %v546_v8 }
  0x31   : > { %498 = vset.pattern.permute.xlu1 %v546_v8  ;;  %502 = vset.pattern.permute.xlu0 %v547_v9 }
  0x32   : > { %249 = vperm.xlu2 %499, %v165_v4   ;;  %245 = vperm.xlu1 %498, %v584_v0  }
  0x33   : > { %271 = vperm.xlu0 %502, %v584_v0  }
  0x3a   : > { %501 = vset.pattern.permute.xlu2 %v548_v10  ;;  %500 = vset.pattern.permute.xlu1 %v548_v10 }
  0x3b   : > { %507 = vset.pattern.permute.xlu0 %v549_v11  ;;  %262 = vperm.xlu2 %501, %v165_v4  }
  0x3c   : > { %258 = vperm.xlu1 %500, %v584_v0   ;;  %301 = vperm.xlu0 %507, %v165_v4  }
  0x43   : > { %504 = vset.pattern.permute.xlu2 %v550_v12 }
  0x44   : > { %503 = vset.pattern.permute.xlu1 %v547_v9  ;;  %284 = vperm.xlu2 %504, %v584_v0  }
  0x45   : > { %275 = vperm.xlu1 %503, %v165_v4   ;;  %512 = vset.pattern.permute.xlu0 %v542_v3 }
  0x46   : > { %336 = vperm.xlu0 %512, %v166_v13  }
  0x4c   : > { %506 = vset.pattern.permute.xlu2 %v549_v11 }
  0x4d   : > { %505 = vset.pattern.permute.xlu1 %v550_v12  ;;  %297 = vperm.xlu2 %506, %v584_v0  }
  0x4e   : > { %288 = vperm.xlu1 %505, %v165_v4   ;;  %517 = vset.pattern.permute.xlu0 %v545_v7 }
  0x4f   : > { %370 = vperm.xlu0 %517, %v166_v13  }
  0x55   : > { %509 = vset.pattern.permute.xlu2 %v551_v14 }
  0x56   : > { %508 = vset.pattern.permute.xlu1 %v551_v14  ;;  %314 = vperm.xlu2 %509, %v165_v4  }
  0x57   : > { %310 = vperm.xlu1 %508, %v584_v0   ;;  %522 = vset.pattern.permute.xlu0 %v549_v11 }
  0x58   : > { %405 = vperm.xlu0 %522, %v166_v13  }
  0x5e   : > { %511 = vset.pattern.permute.xlu2 %v552_v15 }
  0x5f   : > { %510 = vset.pattern.permute.xlu1 %v552_v15  ;;  %327 = vperm.xlu2 %511, %v165_v4  }
  0x60   : > { %323 = vperm.xlu1 %510, %v584_v0  }
  0x67   : > { %514 = vset.pattern.permute.xlu2 %v540_v1  ;;  %v196_v16 = vpop.permute.xlu2 %195 }
  0x68   : > { %513 = vset.pattern.permute.xlu1 %v541_v2  ;;  %349 = vperm.xlu2 %514, %v166_v13  }
  0x69   : > { %342 = vperm.xlu1 %513, %v166_v13  }
  0x6f   : > { %v200_v17 = vpop.permute.xlu2 %199 }
  0x70   : > { %516 = vset.pattern.permute.xlu2 %v543_v5 }
  0x71   : > { %515 = vset.pattern.permute.xlu1 %v544_v6  ;;  %363 = vperm.xlu2 %516, %v166_v13  }
  0x72   : > { %356 = vperm.xlu1 %515, %v166_v13  }
  0x79   : > { %519 = vset.pattern.permute.xlu2 %v548_v10  ;;  %v220_v20 = vpop.permute.xlu2 %219 }
  0x7a   : > { %518 = vset.pattern.permute.xlu1 %v546_v8  ;;  %384 = vperm.xlu2 %519, %v166_v13  }
  0x7b   : > { %377 = vperm.xlu1 %518, %v166_v13  }
  0x80   : > { %v184_v18 = vpop.permute.xlu1 %183  ;;  %v170_v23 = vpop.permute.xlu0 %169 }
  0x81   : > { %v180_v27 = vmul.f32 %v523_v25, %v170_v23 }
  0x82   : > { %521 = vset.pattern.permute.xlu2 %v550_v12  ;;  %v233_v22 = vpop.permute.xlu2 %232 }
  0x83   : > { %520 = vset.pattern.permute.xlu1 %v547_v9  ;;  %398 = vperm.xlu2 %521, %v166_v13   ;;  %v190_v28 = vadd.f32 %v184_v18, %v180_v27 }
  0x84   : > { %391 = vperm.xlu1 %520, %v166_v13  }
  0x85   : > { %524 = vtanh.f32 %v190_v28 }
  0x88   : > { %v188_v19 = vpop.permute.xlu1 %187  ;;  %v175_v29 = vpop.permute.xlu0 %174 }
  0x89   : > { %v181_v46 = vmul.f32 %v523_v25, %v175_v29 }
  0x8b   : > { %v525_v32 = vpop.eup %524  ;;  %v191_v53 = vadd.f32 %v188_v19, %v181_v46 }
  0x8c   : > { %v250_v26 = vpop.permute.xlu2 %249  ;;  %v202_v35 = vperm.slane %v525_v32, 0  ;;  %v213_v36 = vperm.slane %v525_v32, 1  ;;  %v226_v40 = vperm.slane %v525_v32, 2  ;;  %v239_v44 = vperm.slane %v525_v32, 3 }
  0x8d   : > { %v252_v47 = vperm.slane %v525_v32, 4  ;;  %v265_v51 = vperm.slane %v525_v32, 5  ;;  %526 = vtanh.f32 %v191_v53  ;;  %v278_v59 = vperm.slane %v525_v32, 6 }
  0x8e   : > { %v203_v39 = vmul.f32 %v202_v35, %v196_v16  ;;  %v227_v45 = vmul.f32 %v226_v40, %v220_v20  ;;  %v240_v50 = vmul.f32 %v239_v44, %v233_v22  ;;  %v291_v0 = vperm.slane %v525_v32, 7 }
  0x8f   : > { %v204_v3 = vmul.f32 %v202_v35, %v200_v17  ;;  %v254_v20 = vmul.f32 %v252_v47, %v250_v26 }
  0x91   : > { %v211_v21 = vpop.permute.xlu1 %210 }
  0x92   : > { %v207_v33 = vpop.permute.xlu0 %206  ;;  %v215_v62 = vmul.f32 %v213_v36, %v211_v21 }
  0x93   : > { %v214_v38 = vmul.f32 %v213_v36, %v207_v33  ;;  %v527_v2 = vpop.eup %526 }
  0x94   : > { %v217_v7 = vadd.f32 %v215_v62, %v204_v3  ;;  %v304_v8 = vperm.slane %v527_v2, 0  ;;  %v317_v9 = vperm.slane %v527_v2, 1 }
  0x95   : > { %v263_v31 = vpop.permute.xlu2 %262  ;;  %v216_v41 = vadd.f32 %v214_v38, %v203_v39 }
  0x96   : > { %v267_v17 = vmul.f32 %v265_v51, %v263_v31 }
  0x97   : > { %v229_v48 = vadd.f32 %v227_v45, %v216_v41 }
  0x99   : > { %v242_v54 = vadd.f32 %v240_v50, %v229_v48 }
  0x9b   : > { %v224_v24 = vpop.permute.xlu1 %223  ;;  %v237_v43 = vpop.permute.xlu0 %236 }
  0x9c   : > { %v228_v4 = vmul.f32 %v226_v40, %v224_v24  ;;  %v241_v14 = vmul.f32 %v239_v44, %v237_v43 }
  0x9e   : > { %v285_v37 = vpop.permute.xlu2 %284  ;;  %v230_v11 = vadd.f32 %v228_v4, %v217_v7 }
  0x9f   : > { %v292_v5 = vmul.f32 %v291_v0, %v285_v37 }
  0xa0   : > { %v243_v18 = vadd.f32 %v241_v14, %v230_v11 }
  0xa2   : > { %v256_v23 = vadd.f32 %v254_v20, %v243_v18 }
  0xa4   : > { %v246_v30 = vpop.permute.xlu1 %245  ;;  %v269_v27 = vadd.f32 %v267_v17, %v256_v23 }
  0xa5   : > { %v253_v52 = vmul.f32 %v252_v47, %v246_v30  ;;  %v272_v58 = vpop.permute.xlu0 %271 }
  0xa6   : > { %v279_v61 = vmul.f32 %v278_v59, %v272_v58 }
  0xa7   : > { %v298_v49 = vpop.permute.xlu2 %297  ;;  %v255_v57 = vadd.f32 %v253_v52, %v242_v54 }
  0xa8   : > { %v305_v12 = vmul.f32 %v304_v8, %v298_v49 }
  0xae   : > { %v259_v34 = vpop.permute.xlu1 %258  ;;  %v302_v24 = vpop.permute.xlu0 %301 }
  0xaf   : > { %v266_v55 = vmul.f32 %v265_v51, %v259_v34  ;;  %v306_v37 = vmul.f32 %v304_v8, %v302_v24 }
  0xb0   : > { %v315_v63 = vpop.permute.xlu2 %314 }
  0xb1   : > { %v268_v60 = vadd.f32 %v266_v55, %v255_v57  ;;  %v319_v43 = vmul.f32 %v317_v9, %v315_v63 }
  0xb3   : > { %v281_v1 = vadd.f32 %v279_v61, %v268_v60 }
  0xb5   : > { %v294_v10 = vadd.f32 %v292_v5, %v281_v1 }
  0xb7   : > { %v276_v42 = vpop.permute.xlu1 %275  ;;  %v307_v16 = vadd.f32 %v305_v12, %v294_v10 }
  0xb8   : > { %v280_v25 = vmul.f32 %v278_v59, %v276_v42  ;;  %v337_v38 = vpop.permute.xlu0 %336 }
  0xb9   : > { %v328_v15 = vpop.permute.xlu2 %327 }
  0xba   : > { %v282_v30 = vadd.f32 %v280_v25, %v269_v27 }
  0xc0   : > { %v289_v56 = vpop.permute.xlu1 %288 }
  0xc1   : > { %v293_v28 = vmul.f32 %v291_v0, %v289_v56  ;;  %v371_v56 = vpop.permute.xlu0 %370 }
  0xc2   : > { %v350_v29 = vpop.permute.xlu2 %349 }
  0xc3   : > { %v295_v34 = vadd.f32 %v293_v28, %v282_v30 }
  0xc5   : > { %v308_v40 = vadd.f32 %v306_v37, %v295_v34 }
  0xc7   : > { %v321_v42 = vadd.f32 %v319_v43, %v308_v40 }
  0xc9   : > { %v311_v6 = vpop.permute.xlu1 %310  ;;  %v331_v51 = vadd.f32 %v328_v15, %v321_v42 }
  0xca   : > { %v318_v13 = vmul.f32 %v317_v9, %v311_v6  ;;  %v406_v11 = vpop.permute.xlu0 %405 }
  0xcb   : > { %v364_v44 = vpop.permute.xlu2 %363 }
  0xcc   : > { %v320_v19 = vadd.f32 %v318_v13, %v307_v16 }
  0xd2   : > { %v324_v21 = vpop.permute.xlu1 %323 }
  0xd3   : > { %v330_v22 = vadd.f32 %v324_v21, %v320_v19 }
  0xd4   : > { %v385_v55 = vpop.permute.xlu2 %384 }
  0xd5   : > { %528 = vtanh.f32 %v330_v22 }
  0xd6   : > { %530 = vtanh.f32 %v331_v51 }
  0xdb   : > { %v529_v32 = vpop.eup %528  ;;  %v343_v33 = vpop.permute.xlu1 %342 }
  0xdc   : > { %v339_v35 = vperm.slane %v529_v32, 0  ;;  %v345_v36 = vperm.slane %v529_v32, 1  ;;  %v352_v41 = vperm.slane %v529_v32, 2  ;;  %v359_v45 = vperm.slane %v529_v32, 3  ;;  %v531_v0 = vpop.eup %530 }
  0xdd   : > { %v366_v50 = vperm.slane %v529_v32, 4  ;;  %v373_v53 = vperm.slane %v529_v32, 5  ;;  %v380_v59 = vperm.slane %v529_v32, 6  ;;  %v387_v62 = vperm.slane %v529_v32, 7  ;;  %v399_v4 = vpop.permute.xlu2 %398 }
  0xde   : > { %v340_v39 = vmul.f32 %v339_v35, %v337_v38  ;;  %v346_v26 = vmul.f32 %v345_v36, %v343_v33  ;;  %v353_v47 = vmul.f32 %v352_v41, %v350_v29  ;;  %v394_v3 = vperm.slane %v531_v0, 0 }
  0xdf   : > { %v367_v54 = vmul.f32 %v366_v50, %v364_v44  ;;  %v374_v60 = vmul.f32 %v373_v53, %v371_v56  ;;  %v388_v2 = vmul.f32 %v387_v62, %v385_v55  ;;  %v401_v6 = vperm.slane %v531_v0, 1 }
  0xe0   : > { %v347_v31 = vadd.f32 %v346_v26, %v340_v39 }
  0xe1   : > { %v402_v9 = vmul.f32 %v401_v6, %v399_v4 }
  0xe2   : > { %v354_v49 = vadd.f32 %v353_v47, %v347_v31 }
  0xe4   : > { %v357_v46 = vpop.permute.xlu1 %356 }
  0xe5   : > { %v360_v48 = vmul.f32 %v359_v45, %v357_v46 }
  0xe7   : > { %v361_v52 = vadd.f32 %v360_v48, %v354_v49 }
  0xe9   : > { %v368_v57 = vadd.f32 %v367_v54, %v361_v52 }
  0xeb   : > { %v375_v63 = vadd.f32 %v374_v60, %v368_v57 }
  0xed   : > { %v378_v58 = vpop.permute.xlu1 %377 }
  0xee   : > { %v381_v61 = vmul.f32 %v380_v59, %v378_v58 }
  0xf0   : > { %v382_v1 = vadd.f32 %v381_v61, %v375_v63 }
  0xf2   : > { %v389_v7 = vadd.f32 %v388_v2, %v382_v1 }
  0xf6   : > { %v392_v5 = vpop.permute.xlu1 %391 }
  0xf7   : > { %v395_v8 = vmul.f32 %v394_v3, %v392_v5 }
  0xf9   : > { %v396_v10 = vadd.f32 %v395_v8, %v389_v7 }
  0xfb   : > { %v403_v12 = vadd.f32 %v402_v9, %v396_v10 }
  0xfd   : > { %v408_v13 = vadd.f32 %v406_v11, %v403_v12 }
  0xff   : > { %409 = vst [vmem:[%s162_s28] sm:$0x3f] %v408_v13 }
 0x100 PF: > { %s13_s12 = sadd.s32 1, %s538_s12  }
 0x101   : > { %p10_p4 = scmp.ge.s32.totalorder %s13_s12, 4  }
 0x103   :  { %12 = sbr.rel (!%p10_p4) target bundleno = 1 (0x1), region = 62 }

</bundles_post_ra>
